<compile_context>
chip_gen: v7x
topology: tpu7x:2x2x1
jax: 0.10.0
libtpu: 0.0.40
codegen_flags: <defaults>
</compile_context>

<pallas_src>
import functools
import math

import jax
import jax.numpy as jnp
from jax import lax
from jax.experimental import pallas as pl
from jax.experimental.pallas import tpu as pltpu

_EPS = 1e-30  # guards rsqrt on zero-padded rows only; no effect on real data


def _round_up(x, m):
    return ((x + m - 1) // m) * m


def _pick_config():
    """Per-generation defaults: (tb, tc, vmem_limit_bytes)."""
    try:
        vmem = pltpu.get_tpu_info().vmem_capacity_bytes
    except Exception:
        return 512, 1024, None                     # conservative fallback
    if vmem >= 100 * (1 << 20):                    # v5e / v6e: 128 MiB VMEM
        return 512, 1024, 64 * (1 << 20)
    return 512, 1024, 48 * (1 << 20)               # v7x: 64 MiB physical VMEM


def _buffered_spec(block_shape, index_map, n_tiles):
    """Streamed-weight BlockSpec; 3-deep pipeline when the grid is long enough."""
    if n_tiles >= 3:
        try:
            return pl.BlockSpec(block_shape, index_map,
                                pipeline_mode=pl.Buffered(3))
        except TypeError:      # older jax without pipeline_mode kwarg
            pass
    return pl.BlockSpec(block_shape, index_map)


# ---------------------------------------------------------------------------
# Prologue: normalized features (emitted in dot_dtype) + target-class margin
# term a_t, tiled over B.  wl_ref holds the gathered rows weight[label].
# ---------------------------------------------------------------------------
def _prep_kernel(thresh, mm, cos_m, sin_m, x_ref, wl_ref, ex_ref, at_ref):
    x = x_ref[...].astype(jnp.float32)                          # (TB, Dp)
    wl = wl_ref[...].astype(jnp.float32)                        # (TB, Dp)
    x_inv = lax.rsqrt(jnp.maximum(jnp.sum(x * x, axis=-1, keepdims=True), _EPS))
    wl_inv = lax.rsqrt(jnp.maximum(jnp.sum(wl * wl, axis=-1, keepdims=True), _EPS))
    ex = x * x_inv
    cos_t = jnp.sum(ex * (wl * wl_inv), axis=-1, keepdims=True)  # (TB, 1)
    sin_t = jnp.sqrt(jnp.maximum(1.0 - cos_t * cos_t, 0.0))
    # cos(acos(c) + m) == c*cos(m) - sqrt(1-c^2)*sin(m)  when c > thresh
    a_t = jnp.where(cos_t > thresh, cos_t * cos_m - sin_t * sin_m, cos_t - mm)
    ex_ref[...] = ex.astype(ex_ref.dtype)                        # dot_dtype
    at_ref[...] = a_t


# ---------------------------------------------------------------------------
# Large-batch prologue: normalized, dot_dtype, TRANSPOSED weight (Dp, Cp).
# ---------------------------------------------------------------------------
def _w_norm_t_kernel(w_ref, ewt_ref):
    w = w_ref[...].astype(jnp.float32)                           # (TC, Dp)
    winv = lax.rsqrt(jnp.maximum(jnp.sum(w * w, axis=-1, keepdims=True), _EPS))
    ewt_ref[...] = (w * winv).astype(ewt_ref.dtype).T            # (Dp, TC)


# ---------------------------------------------------------------------------
# Main kernel, single-batch-tile path: 1-D grid over class tiles.
# ex / a_t blocks are constant (resident); the raw f32 weight tile is streamed
# once and normalized here (each weight element touched exactly once).
# ---------------------------------------------------------------------------
def _arcneg_1d_kernel(scale, alpha, sigma, ex_ref, w_ref, at_ref, out_ref):
    w = w_ref[...].astype(jnp.float32)                           # (TC, Dp)
    winv = lax.rsqrt(jnp.maximum(jnp.sum(w * w, axis=-1, keepdims=True), _EPS))
    ew = (w * winv).astype(ex_ref.dtype)
    cos = lax.dot_general(                                       # MXU
        ex_ref[...], ew,
        dimension_numbers=(((1,), (1,)), ((), ())),
        preferred_element_type=jnp.float32)                      # (TB, TC)
    diff = cos - at_ref[...]
    t = jnp.exp(diff * diff * (-1.0 / sigma))                    # EUP
    # scale*(alpha*t*cos + alpha*t - 1) == (scale*alpha)*t*(cos+1) - scale
    out_ref[...] = ((scale * alpha) * t * (cos + 1.0) - scale).astype(out_ref.dtype)


# ---------------------------------------------------------------------------
# Main kernel, large-batch path: 2-D grid (class tile OUTER, batch tile INNER)
# so the pre-normalized transposed weight tile is reused across the inner loop.
# ---------------------------------------------------------------------------
def _arcneg_2d_kernel(scale, alpha, sigma, ex_ref, ewt_ref, at_ref, out_ref):
    cos = lax.dot_general(                                       # MXU
        ex_ref[...], ewt_ref[...],
        dimension_numbers=(((1,), (0,)), ((), ())),
        preferred_element_type=jnp.float32)                      # (TB, TC)
    diff = cos - at_ref[...]
    t = jnp.exp(diff * diff * (-1.0 / sigma))
    out_ref[...] = ((scale * alpha) * t * (cos + 1.0) - scale).astype(out_ref.dtype)


# ---------------------------------------------------------------------------
# Wrapper
# ---------------------------------------------------------------------------
def arcnegface_forward(x, weight, label, *, scale=64.0, margin=0.5,
                       alpha=1.2, sigma=2.0, tb=None, tc=None,
                       dot_dtype=jnp.bfloat16, out_dtype=jnp.float32,
                       single_batch_tile=None):
    """x: (B, D) f32, weight: (C, D) f32, label: (B,) int -> logits (B, C)."""
    B, D = x.shape
    C, D2 = weight.shape
    assert D == D2

    def_tb, def_tc, vmem_limit = _pick_config()
    tb = def_tb if tb is None else tb
    tc = def_tc if tc is None else tc
    assert tb % 8 == 0 and tc % 128 == 0

    x = x.astype(jnp.float32)
    weight = weight.astype(jnp.float32)
    label = label.astype(jnp.int32).reshape(B)

    # TODO(synk): the target-row gather weight[label] stays in XLA; a Pallas
    # pl.Element-indexed gather is possible but the (B, D) gather is negligible.
    wl = jnp.take(weight, label, axis=0)                         # (B, D)

    # Zero-pad the feature dim to a lane-dense multiple of 128 (free w.r.t.
    # norms and dot products).
    # TODO(synk): prefer a multiple of 256 on v6e/v7x when D is small to fill
    # the 256-wide MXU K dimension (not auto-detected here).
    Dp = _round_up(D, 128)
    if Dp != D:
        x = jnp.pad(x, ((0, 0), (0, Dp - D)))
        wl = jnp.pad(wl, ((0, 0), (0, Dp - D)))
        weight = jnp.pad(weight, ((0, 0), (0, Dp - D)))

    # Class-tile size: largest power-of-two-scaled divisor of Cp up to `tc`,
    # with >=2 class tiles when possible so v7x's megacore splits on classes.
    Cp = _round_up(C, 128)
    TC = tc
    while Cp % TC != 0:
        TC //= 2
    TC = max(TC, 128)
    if Cp // TC < 2 and Cp >= 256 and (Cp // 2) % 128 == 0:
        TC = Cp // 2
    if Cp != C:
        weight = jnp.pad(weight, ((0, Cp - C), (0, 0)))

    if single_batch_tile is None:
        single_batch_tile = _round_up(B, 8) <= 2048
    TB = _round_up(B, 8) if single_batch_tile else min(tb, _round_up(B, 8))
    Bp = _round_up(B, TB)
    if Bp != B:
        x = jnp.pad(x, ((0, Bp - B), (0, 0)))
        wl = jnp.pad(wl, ((0, Bp - B), (0, 0)))

    thresh = math.cos(math.pi - margin)
    mm = math.sin(math.pi - margin) * margin
    cos_m, sin_m = math.cos(margin), math.sin(margin)

    # ---- prologue: normalized features (dot_dtype) + target margin a_t -----
    ex, a_t = pl.pallas_call(
        functools.partial(_prep_kernel, thresh, mm, cos_m, sin_m),
        grid=(Bp // TB,),
        in_specs=[pl.BlockSpec((TB, Dp), lambda i: (i, 0)),
                  pl.BlockSpec((TB, Dp), lambda i: (i, 0))],
        out_specs=[pl.BlockSpec((TB, Dp), lambda i: (i, 0)),
                   pl.BlockSpec((TB, 1), lambda i: (i, 0))],
        out_shape=(jax.ShapeDtypeStruct((Bp, Dp), dot_dtype),
                   jax.ShapeDtypeStruct((Bp, 1), jnp.float32)),
        compiler_params=pltpu.CompilerParams(dimension_semantics=("parallel",)),
    )(x, wl)

    n_ctiles = Cp // TC
    dot_bytes = jnp.dtype(dot_dtype).itemsize
    out_bytes = Bp * Cp * jnp.dtype(out_dtype).itemsize

    if single_batch_tile:
        # ---- 1-D grid over class tiles; weight read exactly once from HBM ---
        cost = pl.CostEstimate(
            flops=2 * Bp * Cp * Dp,
            transcendentals=Bp * Cp,
            bytes_accessed=4 * Cp * Dp + Bp * Dp * dot_bytes + 4 * Bp + out_bytes)
        logits = pl.pallas_call(
            functools.partial(_arcneg_1d_kernel, float(scale), float(alpha),
                              float(sigma)),
            grid=(n_ctiles,),
            in_specs=[
                pl.BlockSpec((TB, Dp), lambda j: (0, 0)),        # ex (resident)
                _buffered_spec((TC, Dp), lambda j: (j, 0), n_ctiles),  # weight
                pl.BlockSpec((TB, 1), lambda j: (0, 0)),         # a_t (resident)
            ],
            out_specs=pl.BlockSpec((TB, TC), lambda j: (0, j)),
            out_shape=jax.ShapeDtypeStruct((Bp, Cp), out_dtype),
            compiler_params=pltpu.CompilerParams(
                dimension_semantics=("parallel",),
                vmem_limit_bytes=vmem_limit),
            cost_estimate=cost,
        )(ex, weight, a_t)
    else:
        # ---- pre-normalized, dot_dtype, transposed weight (Dp, Cp) ----------
        ewt = pl.pallas_call(
            _w_norm_t_kernel,
            grid=(n_ctiles,),
            in_specs=[pl.BlockSpec((TC, Dp), lambda j: (j, 0))],
            out_specs=pl.BlockSpec((Dp, TC), lambda j: (0, j)),
            out_shape=jax.ShapeDtypeStruct((Dp, Cp), dot_dtype),
            compiler_params=pltpu.CompilerParams(dimension_semantics=("parallel",)),
        )(weight)

        cost = pl.CostEstimate(
            flops=2 * Bp * Cp * Dp,
            transcendentals=Bp * Cp,
            bytes_accessed=(Cp * Dp * dot_bytes                  # ewt, once (outer)
                            + n_ctiles * Bp * Dp * dot_bytes     # ex, per class tile
                            + n_ctiles * Bp * 4                  # a_t, per class tile
                            + out_bytes))
        logits = pl.pallas_call(
            functools.partial(_arcneg_2d_kernel, float(scale), float(alpha),
                              float(sigma)),
            grid=(n_ctiles, Bp // TB),     # class tile outer, batch tile inner
            in_specs=[
                pl.BlockSpec((TB, Dp), lambda jc, ib: (ib, 0)),  # ex
                pl.BlockSpec((Dp, TC), lambda jc, ib: (0, jc)),  # ewt (reused over ib)
                pl.BlockSpec((TB, 1), lambda jc, ib: (ib, 0)),   # a_t
            ],
            out_specs=pl.BlockSpec((TB, TC), lambda jc, ib: (ib, jc)),
            out_shape=jax.ShapeDtypeStruct((Bp, Cp), out_dtype),
            compiler_params=pltpu.CompilerParams(
                dimension_semantics=("parallel", "parallel"),
                vmem_limit_bytes=vmem_limit),
            cost_estimate=cost,
        )(ex, ewt, a_t)

    # ---- target-logit substitution: tiny B-element scatter, kept in XLA ----
    logits = logits[:B, :C]
    logits = logits.at[jnp.arange(B), label].set(
        (scale * a_t[:B, 0]).astype(logits.dtype))
    return logits


# ---------------------------------------------------------------------------
# Pure-JAX reference (mirrors the PyTorch forward, easy_margin=False).
# ---------------------------------------------------------------------------
def _reference(x, weight, label, *, scale=64.0, margin=0.5, alpha=1.2, sigma=2.0):
    thresh = math.cos(math.pi - margin)
    mm = math.sin(math.pi - margin) * margin
    ex = x / jnp.linalg.norm(x, axis=1, keepdims=True)
    ew = weight / jnp.linalg.norm(weight, axis=1, keepdims=True)
    cos = jnp.matmul(ex, ew.T, precision=lax.Precision.HIGHEST)
    onehot = jax.nn.one_hot(label, weight.shape[0], dtype=cos.dtype)
    cos_t = jnp.sum(cos * onehot, axis=1, keepdims=True)
    a_t = jnp.where(cos_t > thresh, jnp.cos(jnp.arccos(cos_t) + margin), cos_t - mm)
    t = alpha * jnp.exp(-((cos - a_t) ** 2) / sigma)
    return scale * (onehot * a_t + (1.0 - onehot) * (t * cos + t - 1.0))


if __name__ == "__main__":
    # Small demo shapes; deliberately NOT tile-aligned to exercise D/B/C padding
    # (96 -> 128 features, 100 -> 104/128 rows, 500 -> 512 classes).
    B, IN_FEATURES, OUT_FEATURES = 100, 96, 500

    key = jax.random.PRNGKey(0)
    k_x, k_w, k_lbl = jax.random.split(key, 3)

    x = jax.random.normal(k_x, (B, IN_FEATURES), dtype=jnp.float32)
    stdv = 1.0 / math.sqrt(IN_FEATURES)          # matches reset_parameters()
    weight = jax.random.uniform(k_w, (OUT_FEATURES, IN_FEATURES),
                                dtype=jnp.float32, minval=-stdv, maxval=stdv)
    label = jax.random.randint(k_lbl, (B,), 0, OUT_FEATURES, dtype=jnp.int32)

    ref = _reference(x, weight, label)

    # Exact-precision path (f32 MXU), forced large-batch 2x2 grid to exercise
    # the pre-normalized transposed-weight prologue + padding.
    out_f32 = jax.block_until_ready(
        arcnegface_forward(x, weight, label, tb=64, tc=256,
                           dot_dtype=jnp.float32, single_batch_tile=False))
    assert out_f32.shape == (B, OUT_FEATURES)
    err_f32 = float(jnp.max(jnp.abs(out_f32 - ref)))
    assert err_f32 < 2e-3, err_f32

    # Default fast path: resident batch tile, bf16 MXU operands (f32 accum).
    # bf16 operand rounding (~2^-9) times worst-case logits sensitivity
    # (O(scale)) -> allow O(1) absolute error on logits of magnitude ~scale=64.
    out_bf16 = jax.block_until_ready(arcnegface_forward(x, weight, label))
    assert out_bf16.shape == (B, OUT_FEATURES)
    err_bf16 = float(jnp.max(jnp.abs(out_bf16 - ref)))
    assert err_bf16 < 1.0, err_bf16

    print("KERNEL_OK")
</pallas_src>

<mosaic_0001>
module attributes {stable_mosaic.version = 11 : i64} {
  func.func @_prep_kernel(%arg0: i32, %arg1: memref<64x128xf32, #tpu.memory_space<vmem>>, %arg2: memref<64x128xf32, #tpu.memory_space<vmem>>, %arg3: memref<64x128xf32, #tpu.memory_space<vmem>>, %arg4: memref<64x1xf32, #tpu.memory_space<vmem>>) attributes {dimension_semantics = [#tpu.dimension_semantics<parallel>], iteration_bounds = array<i64: 2>, scalar_prefetch = 0 : i64, scratch_operands = 0 : i64, tpu.core_type = #tpu.core_type<tc>, window_params = [{transform_indices = @transform_0, window_bounds = array<i64: 64, 128>}, {transform_indices = @transform_1, window_bounds = array<i64: 64, 128>}, {transform_indices = @transform_2, window_bounds = array<i64: 64, 128>}, {transform_indices = @transform_3, window_bounds = array<i64: 64, 1>}]} {
    %c0 = arith.constant 0 : index
    %c0_0 = arith.constant 0 : index
    %0 = vector.load %arg1[%c0, %c0_0] : memref<64x128xf32, #tpu.memory_space<vmem>>, vector<64x128xf32>
    %c0_1 = arith.constant 0 : index
    %c0_2 = arith.constant 0 : index
    %1 = vector.load %arg2[%c0_1, %c0_2] : memref<64x128xf32, #tpu.memory_space<vmem>>, vector<64x128xf32>
    %2 = arith.mulf %0, %0 : vector<64x128xf32>
    %cst = arith.constant dense<0.000000e+00> : vector<64xf32>
    %3 = vector.multi_reduction <add>, %2, %cst [1] : vector<64x128xf32> to vector<64xf32>
    %4 = vector.shape_cast %3 : vector<64xf32> to vector<64x1xf32>
    %cst_3 = arith.constant 1.000000e-30 : f32
    %5 = vector.broadcast %cst_3 : f32 to vector<64x1xf32>
    %6 = arith.maximumf %4, %5 : vector<64x1xf32>
    %7 = math.rsqrt %6 : vector<64x1xf32>
    %8 = arith.mulf %1, %1 : vector<64x128xf32>
    %cst_4 = arith.constant dense<0.000000e+00> : vector<64xf32>
    %9 = vector.multi_reduction <add>, %8, %cst_4 [1] : vector<64x128xf32> to vector<64xf32>
    %10 = vector.shape_cast %9 : vector<64xf32> to vector<64x1xf32>
    %cst_5 = arith.constant 1.000000e-30 : f32
    %11 = vector.broadcast %cst_5 : f32 to vector<64x1xf32>
    %12 = arith.maximumf %10, %11 : vector<64x1xf32>
    %13 = math.rsqrt %12 : vector<64x1xf32>
    %14 = vector.broadcast %7 : vector<64x1xf32> to vector<64x128xf32>
    %15 = arith.mulf %0, %14 : vector<64x128xf32>
    %16 = vector.broadcast %13 : vector<64x1xf32> to vector<64x128xf32>
    %17 = arith.mulf %1, %16 : vector<64x128xf32>
    %18 = arith.mulf %15, %17 : vector<64x128xf32>
    %cst_6 = arith.constant dense<0.000000e+00> : vector<64xf32>
    %19 = vector.multi_reduction <add>, %18, %cst_6 [1] : vector<64x128xf32> to vector<64xf32>
    %20 = vector.shape_cast %19 : vector<64xf32> to vector<64x1xf32>
    %21 = arith.mulf %20, %20 : vector<64x1xf32>
    %cst_7 = arith.constant 1.000000e+00 : f32
    %22 = vector.broadcast %cst_7 : f32 to vector<64x1xf32>
    %23 = arith.subf %22, %21 : vector<64x1xf32>
    %cst_8 = arith.constant 0.000000e+00 : f32
    %24 = vector.broadcast %cst_8 : f32 to vector<64x1xf32>
    %25 = arith.maximumf %23, %24 : vector<64x1xf32>
    %26 = math.sqrt %25 : vector<64x1xf32>
    %cst_9 = arith.constant -0.87758255 : f32
    %27 = vector.broadcast %cst_9 : f32 to vector<64x1xf32>
    %28 = arith.cmpf ogt, %20, %27 : vector<64x1xf32>
    %cst_10 = arith.constant 0.87758255 : f32
    %29 = vector.broadcast %cst_10 : f32 to vector<64x1xf32>
    %30 = arith.mulf %20, %29 : vector<64x1xf32>
    %cst_11 = arith.constant 0.47942555 : f32
    %31 = vector.broadcast %cst_11 : f32 to vector<64x1xf32>
    %32 = arith.mulf %26, %31 : vector<64x1xf32>
    %33 = arith.subf %30, %32 : vector<64x1xf32>
    %cst_12 = arith.constant 0.239712775 : f32
    %34 = vector.broadcast %cst_12 : f32 to vector<64x1xf32>
    %35 = arith.subf %20, %34 : vector<64x1xf32>
    %36 = arith.select %28, %33, %35 : vector<64x1xi1>, vector<64x1xf32>
    %c0_13 = arith.constant 0 : index
    %c0_14 = arith.constant 0 : index
    %37 = vector.load %arg3[%c0_13, %c0_14] : memref<64x128xf32, #tpu.memory_space<vmem>>, vector<64x128xf32>
    tpu.vector_store %arg3[%c0_13, %c0_14], %15 {strides = array<i32>} : memref<64x128xf32, #tpu.memory_space<vmem>>, vector<64x128xf32>,
    %c0_15 = arith.constant 0 : index
    %c0_16 = arith.constant 0 : index
    %38 = vector.load %arg4[%c0_15, %c0_16] : memref<64x1xf32, #tpu.memory_space<vmem>>, vector<64x1xf32>
    tpu.vector_store %arg4[%c0_15, %c0_16], %36 {strides = array<i32>} : memref<64x1xf32, #tpu.memory_space<vmem>>, vector<64x1xf32>,
    return
  }
  func.func @transform_0(%arg0: i32) -> (i32, i32) {
    %c0_i32 = arith.constant 0 : i32
    %c0_i32_0 = arith.constant 0 : i32
    return %arg0, %c0_i32 : i32, i32
  }
  func.func @transform_1(%arg0: i32) -> (i32, i32) {
    %c0_i32 = arith.constant 0 : i32
    %c0_i32_0 = arith.constant 0 : i32
    return %arg0, %c0_i32 : i32, i32
  }
  func.func @transform_2(%arg0: i32) -> (i32, i32) {
    %c0_i32 = arith.constant 0 : i32
    %c0_i32_0 = arith.constant 0 : i32
    return %arg0, %c0_i32 : i32, i32
  }
  func.func @transform_3(%arg0: i32) -> (i32, i32) {
    %c0_i32 = arith.constant 0 : i32
    %c0_i32_0 = arith.constant 0 : i32
    return %arg0, %c0_i32 : i32, i32
  }
}

</mosaic_0001>

<bundles_post_ra>
// kernel: tpu_custom_call.1
= control target key start
LH: loop header
LB: loop body
LE: loop exit
PB: predicated region body
PF: predicated region fallthrough
CT: control target
= control target key end

     0   :  { %9 = vsyncpa [#allocation3], 0  ;;  %s1439_s0 = inlined_call_operand.hbm [shape: f32[128,128], index: 0, kind: input, shape index: {}]   ;;  %s1440_s1 = inlined_call_operand.hbm [shape: f32[128,128], index: 1, kind: input, shape index: {}]   ;;  %s1441_s2 = inlined_call_operand.hbm [shape: f32[128,128], index: 2, kind: output, shape index: {0}]   ;;  %s1442_s3 = inlined_call_operand.vmem [shape: f32[128,1], index: 3, kind: output, shape index: {1}]  }
   0x1   :  { %11 = vsyncpa [#allocation3 + $0x1], 0 }
   0x2   :  { %12 = vsyncpa [#allocation6], 0 }
   0x3   :  { %14 = vsyncpa [#allocation6 + $0x1], 0 }
   0x4   :  { %15 = vsyncpa [#allocation4], 0 }
   0x5   :  { %17 = vsyncpa [#allocation4 + $0x1], 0  ;;  %s964_s12 = smov 0   ;;  %s966_s13 = smov 0  }
   0x6   :  { %s968_s14 = smov 0   ;;  %s970_s15 = smov 0  }
   0x7 LB: > { %s985_s16 = sadd.s32 4294967295, %s935_s15   ;;  %s671_s17 = sadd.s32 4294967294, %s935_s15   ;;  %s935_s15 = sphi %s970_s15, %s1458_s15   ;;  %s931_s14 = sphi %s968_s14, %s1457_s14   ;;  %s927_s13 = sphi %s966_s13, %s1456_s13   ;;  %s923_s12 = sphi %s964_s12, %s1455_s12  }
   0x8   : > { %s989_s18 = sadd.s32 1, %s935_s15   ;;  %s30_s19 = sadd.s32 1, %s931_s14 }
   0x9   : > { %s27_s20 = ssub.s32 %s935_s15, %s989_s18  ;;  %p37_p0 = scmp.ne.s32.totalorder %s931_s14, %s927_s13 }
   0xa   : > { %p28_p1 = scmp.eq.s32.totalorder %s27_s20, 0  ;;  %p38_p2 = scmp.eq.s32.totalorder %s935_s15, 0 }
   0xb   : > { %p43_p3 = scmp.ne.s32.totalorder %s927_s13, %s923_s12  ;;  %p44_p4 = scmp.eq.s32.totalorder %s985_s16, 0 }
   0xc   : > { %s1001_s21 = scalar_select %p28_p1, %s931_s14, %s30_s19  }
   0xd   : > { %p1003_p5 = por %p38_p2, %p37_p0  ;;  %p1007_p6 = por %p44_p4, %p43_p3 }
   0xe   : > { %p93_p7 = scmp.eq.s32.totalorder %s985_s16, 1  ;;  %p99_p8 = scmp.eq.s32.totalorder %s671_s17, 1 }
   0xf   : > { %s1446_s23 = scalar_select %p1007_p6, 1, 0 }
  0x10   : > { %p719_p10 = scmp.lt.s32.totalorder %s935_s15, 2  ;;  %p1014_p11 = por %p93_p7, %p37_p0 }
  0x11   : > { %p1018_p12 = por %p99_p8, %p43_p3  ;;  %s1023_s26 = sand.u32 1, %s931_s14  }
  0x12   : > { %s1447_s24 = scalar_select %p1014_p11, 1, 0 }
  0x13   : > { %s1448_s25 = scalar_select %p1018_p12, 1, 0 }
  0x14   : > { %s699_s27 = sshll.u32 %s935_s15, 10  ;;  %s674_s28 = sshll.u32 %s1023_s26, 6 }
  0x15   : > { %s1032_s4 = scalar_lea.hbm %s1439_s0, %s699_s27  ;;  %s149_s5 = scalar_lea.vmem [#allocation2], %s674_s28 }
  0x16   : > { %s156_s6 = sshll.u32 %s149_s5, 4  ;;  %p1038_p13 = pnand %p719_p10, %p1003_p5  ;;  %s1042_s6 = int_to_ptr.vmem [resolvable:$true] %s156_s6 }
  0x17   : > { %s146_s8 = scalar_lea.sflag [#allocation3], %s1023_s26  ;;  %s805_s9 = scalar_lea.hbm %s1032_s4, 1024 }
  0x18   : > { %p806_p0 = scmp.ne.s32.totalorder %s1032_s4, %s805_s9  ;;  %p807_p1 = pneg %p1038_p13 }
  0x19   : > { %s810_s17 = scalar_lea.hbm %s1439_s0, 2048  ;;  %p811_p4 = scmp.lt.u32.totalorder %s1032_s4, %s1439_s0 }
  0x1a   : > { %p808_p2 = pnand %p807_p1, %p806_p0  ;;  %p812_p5 = scmp.lt.u32.totalorder %s810_s17, %s805_s9 }
  0x1b   : > { %p814_p8 = scmp.lt.u32.totalorder %s805_s9, %s1032_s4 }
  0x1c   : > { %p809_p3 = pneg %p808_p2  ;;  %p813_p7 = por %p812_p5, %p811_p4 }
  0x1e   : > { %p815_p10 = por %p814_p8, %p813_p7 }
  0x20   : > { %p816_p9 = pnand %p815_p10, %p809_p3 }
  0x22   : > { %819 = shalt.err (!%p816_p9)
}
  0x23   : > { %s820_s22 = scalar_lea.vmem %s1042_s6, 1024  ;;  %s937_s29 = smov [#allocation2]  }
  0x24   : > { %p821_p0 = scmp.ne.s32.totalorder %s1042_s6, %s820_s22  ;;  %s825_s30 = sshll.u32 %s937_s29, 4  ;;  %s826_s30 = int_to_ptr.vmem [resolvable:$false] %s825_s30 }
  0x25   : > { %s827_s5 = scalar_lea.vmem %s826_s30, 2048  ;;  %p828_p11 = scmp.lt.s32.totalorder %s1042_s6, %s826_s30 }
  0x26   : > { %p823_p2 = pnand %p821_p0, %p807_p1  ;;  %p829_p4 = scmp.lt.s32.totalorder %s827_s5, %s820_s22 }
  0x28   : > { %p824_p12 = pneg %p823_p2  ;;  %p830_p5 = por %p829_p4, %p828_p11 }
  0x2a   : > { %p831_p7 = pnand %p830_p5, %p824_p12 }
  0x2c   : > { %834 = shalt.err (!%p831_p7)
}
  0x2d   : > { %s938_s9 = smov 128   ;;  %s939_s10 = smov 8  }
  0x2e   : > { %711 = dma.hbm_to_vmem [thread:$0]  (!%p1038_p13), %s1032_s4, 1024, %s1042_s6, %s146_s8, %s938_s9, %s938_s9, %s939_s10  }
  0x2f   : > { %p680_p9 = scmp.ge.s32.totalorder %s935_s15, 1  ;;  %p185_p11 = scmp.lt.s32.totalorder %s935_s15, 3 }
  0x30   : > { %s1086_s20 = scalar_lea.hbm %s1440_s1, %s699_s27  ;;  %s170_s22 = scalar_lea.vmem [#allocation5], %s674_s28 }
  0x31   : > { %p1077_p12 = pnand %p680_p9, %p185_p11  ;;  %s177_s29 = sshll.u32 %s170_s22, 4  ;;  %s1090_s29 = int_to_ptr.vmem [resolvable:$true] %s177_s29 }
  0x32   : > { %s167_s4 = scalar_lea.sflag [#allocation6], %s1023_s26  ;;  %s835_s6 = scalar_lea.hbm %s1086_s20, 1024 }
  0x33   : > { %p836_p3 = scmp.ne.s32.totalorder %s1086_s20, %s835_s6  ;;  %s840_s27 = scalar_lea.hbm %s1440_s1, 2048 }
  0x34   : > { %p841_p0 = scmp.lt.u32.totalorder %s1086_s20, %s1440_s1  ;;  %p842_p2 = scmp.lt.u32.totalorder %s840_s27, %s835_s6 }
  0x35   : > { %p838_p8 = pnand %p836_p3, %p807_p1  ;;  %p844_p5 = scmp.lt.u32.totalorder %s835_s6, %s1086_s20 }
  0x36   : > { %p843_p4 = por %p842_p2, %p841_p0 }
  0x37   : > { %p839_p10 = pneg %p838_p8 }
  0x38   : > { %p845_p7 = por %p844_p5, %p843_p4 }
  0x3a   : > { %p846_p9 = pnand %p845_p7, %p839_p10 }
  0x3c   : > { %849 = shalt.err (!%p846_p9)
}
  0x3d   : > { %s850_s28 = scalar_lea.vmem %s1090_s29, 1024  ;;  %s940_s19 = smov [#allocation5]  }
  0x3e   : > { %p851_p11 = scmp.ne.s32.totalorder %s1090_s29, %s850_s28  ;;  %s855_s22 = sshll.u32 %s940_s19, 4  ;;  %s856_s22 = int_to_ptr.vmem [resolvable:$false] %s855_s22 }
  0x3f   : > { %s857_s8 = scalar_lea.vmem %s856_s22, 2048  ;;  %p858_p6 = scmp.lt.s32.totalorder %s1090_s29, %s856_s22 }
  0x40   : > { %p853_p3 = pnand %p851_p11, %p807_p1  ;;  %p859_p0 = scmp.lt.s32.totalorder %s857_s8, %s850_s28 }
  0x42   : > { %p854_p8 = pneg %p853_p3  ;;  %p860_p2 = por %p859_p0, %p858_p6 }
  0x44   : > { %p861_p4 = pnand %p860_p2, %p854_p8 }
  0x46   : > { %864 = shalt.err (!%p861_p4)
}
  0x47   : > { %714 = dma.hbm_to_vmem [thread:$0]  (!%p1038_p13), %s1086_s20, 1024, %s1090_s29, %s167_s4, %s938_s9, %s938_s9, %s939_s10  }
  0x48   : > { %189 = sbr.rel (%p1077_p12) target bundleno = 442 (0x1ba), region = 28  ;;  %s1124_s6 = sand.u32 (!%p1077_p12), 1, %s927_s13  }
  0x49   : > { %s1127_s30 = sshll.u32 (!%p1077_p12), %s1124_s6, 6  ;;  %s192_s7 = scalar_lea.sflag (!%p1077_p12), [#allocation3], %s1124_s6 }
  0x4a   : > { %s195_s27 = scalar_lea.vmem (!%p1077_p12), [#allocation2], %s1127_s30  ;;  %p1451_p6 = scmp.ne.s32.totalorder (!%p1077_p12), %s1446_s23, 0 }
  0x4f   : > { %910 = dma.done.wait (%p1451_p6), %s192_s7, 1024  }
  0x50   : > { %912 = vsyncadd (%p1451_p6), %s192_s7, 4294966272  ;;  %s201_s26 = scalar_lea.sflag [#allocation6], %s1124_s6  ;;  %s1137_s9 = scalar_lea.vmem [#allocation5], %s1127_s30 }
  0x51   : > { %914 = dma.done.wait (%p1451_p6), %s201_s26, 1024  }
  0x52   : > { %916 = vsyncadd (%p1451_p6), %s201_s26, 4294966272  ;;  %v1143_v0 = vld [vmem:[%s195_s27 + $0x10] sm:$0xff]  ;;  %v1145_v1 = vld [vmem:[%s195_s27] sm:$0xff]  ;;  %s1220_s23 = scalar_lea.vmem [#allocation7], %s1127_s30  ;;  %s701_s11 = sshll.u32 %s985_s16, 10 }
  0x53   : > { %v1147_v2 = vld [vmem:[%s195_s27 + $0x18] sm:$0xff]  ;;  %v264_v3 = vmul.f32 %v1143_v0, %v1143_v0  ;;  %v262_v4 = vmul.f32 %v1145_v1, %v1145_v1  ;;  %v1153_v5 = vld [vmem:[%s195_s27 + $0x8] sm:$0xff]  ;;  %v1161_v9 = vld [vmem:[%s195_s27 + $0x20] sm:$0xff]  ;;  %s546_s10 = sshll.u32 %s1220_s23, 4  ;;  %s1251_s4 = scalar_lea.hbm %s1441_s2, %s701_s11  ;;  %s1253_s10 = int_to_ptr.vmem [resolvable:$true] %s546_s10 }
  0x54   : > { %v265_v6 = vmul.f32 %v1147_v2, %v1147_v2  ;;  %v263_v7 = vmul.f32 %v1153_v5, %v1153_v5  ;;  %v1159_v8 = vld [vmem:[%s195_s27 + $0x28] sm:$0xff]  ;;  %v266_v11 = vmul.f32 %v1161_v9, %v1161_v9  ;;  %v1167_v12 = vld [vmem:[%s195_s27 + $0x38] sm:$0xff]  ;;  %v1169_v13 = vld [vmem:[%s195_s27 + $0x30] sm:$0xff]  ;;  %s528_s5 = scalar_lea.sflag [#allocation4], %s1124_s6  ;;  %s865_s17 = scalar_lea.vmem %s1253_s10, 1024 }
  0x55   : > { %274 = vadd.xlane.f32.xlu1 %v264_v3  ;;  %270 = vadd.xlane.f32.xlu0 %v262_v4  ;;  %v267_v10 = vmul.f32 %v1159_v8, %v1159_v8  ;;  %v269_v14 = vmul.f32 %v1167_v12, %v1167_v12  ;;  %v268_v15 = vmul.f32 %v1169_v13, %v1169_v13  ;;  %v1176_v16 = vld [vmem:[%s1137_s9 + $0x8] sm:$0xff]  ;;  %v1179_v17 = vld [vmem:[%s1137_s9] sm:$0xff]  ;;  %v1186_v20 = vld [vmem:[%s1137_s9 + $0x18] sm:$0xff]  ;;  %p866_p13 = scmp.ne.s32.totalorder %s1253_s10, %s865_s17  ;;  %p1452_p1 = scmp.ne.s32.totalorder %s1447_s24, 0 }
  0x56   : > { %v303_v18 = vmul.f32 %v1176_v16, %v1176_v16  ;;  %v302_v19 = vmul.f32 %v1179_v17, %v1179_v17  ;;  %v1189_v21 = vld [vmem:[%s1137_s9 + $0x10] sm:$0xff]  ;;  %v305_v22 = vmul.f32 %v1186_v20, %v1186_v20  ;;  %v1196_v24 = vld [vmem:[%s1137_s9 + $0x28] sm:$0xff]  ;;  %v1199_v25 = vld [vmem:[%s1137_s9 + $0x20] sm:$0xff]  ;;  %s941_s28 = smov [#allocation7]  }
  0x57   : > { %v304_v23 = vmul.f32 %v1189_v21, %v1189_v21  ;;  %v307_v26 = vmul.f32 %v1196_v24, %v1196_v24  ;;  %v306_v27 = vmul.f32 %v1199_v25, %v1199_v25  ;;  %v1206_v28 = vld [vmem:[%s1137_s9 + $0x38] sm:$0xff]  ;;  %v1209_v29 = vld [vmem:[%s1137_s9 + $0x30] sm:$0xff]  ;;  %p867_p12 = pnand %p866_p13, %p1452_p1  ;;  %s869_s19 = sshll.u32 %s941_s28, 4  ;;  %s870_s19 = int_to_ptr.vmem [resolvable:$false] %s869_s19 }
  0x58   : > { %v309_v30 = vmul.f32 %v1206_v28, %v1206_v28  ;;  %v308_v31 = vmul.f32 %v1209_v29, %v1209_v29  ;;  %s871_s22 = scalar_lea.vmem %s870_s19, 2048  ;;  %p872_p5 = scmp.lt.s32.totalorder %s1253_s10, %s870_s19 }
  0x59   : > { %276 = vadd.xlane.f32.xlu1 %v265_v6  ;;  %272 = vadd.xlane.f32.xlu0 %v263_v7  ;;  %p868_p10 = pneg %p867_p12  ;;  %p873_p7 = scmp.lt.s32.totalorder %s871_s22, %s865_s17 }
  0x5b   : > { %p874_p9 = por %p873_p7, %p872_p5 }
  0x5d   : > { %280 = vadd.xlane.f32.xlu1 %v267_v10  ;;  %278 = vadd.xlane.f32.xlu0 %v266_v11  ;;  %p875_p11 = pnand %p874_p9, %p868_p10 }
  0x61   : > { %284 = vadd.xlane.f32.xlu1 %v269_v14  ;;  %282 = vadd.xlane.f32.xlu0 %v268_v15 }
  0x65   : > { %312 = vadd.xlane.f32.xlu1 %v303_v18  ;;  %310 = vadd.xlane.f32.xlu0 %v302_v19 }
  0x69   : > { %316 = vadd.xlane.f32.xlu1 %v305_v22  ;;  %314 = vadd.xlane.f32.xlu0 %v304_v23 }
  0x6d   : > { %320 = vadd.xlane.f32.xlu1 %v307_v26  ;;  %318 = vadd.xlane.f32.xlu0 %v306_v27 }
  0x71   : > { %324 = vadd.xlane.f32.xlu1 %v309_v30  ;;  %322 = vadd.xlane.f32.xlu0 %v308_v31 }
  0xe2   : > { %v275_v32 = vpop.xlane.xlu1 %274  ;;  %v271_v33 = vpop.xlane.xlu0 %270 }
  0xe3   : > { %v288_v34 = vmax.f32 %v275_v32, 1e-30  ;;  %v286_v35 = vmax.f32 %v271_v33, 1e-30 }
  0xe5   : > { %757 = vrsqrt.f32 %v288_v34 }
  0xe6   : > { %759 = vrsqrt.f32 %v286_v35  ;;  %v277_v36 = vpop.xlane.xlu1 %276  ;;  %v273_v37 = vpop.xlane.xlu0 %272 }
  0xe7   : > { %v289_v38 = vmax.f32 %v277_v36, 1e-30  ;;  %v287_v39 = vmax.f32 %v273_v37, 1e-30 }
  0xe9   : > { %761 = vrsqrt.f32 %v289_v38 }
  0xea   : > { %763 = vrsqrt.f32 %v287_v39  ;;  %v281_v40 = vpop.xlane.xlu1 %280  ;;  %v279_v41 = vpop.xlane.xlu0 %278 }
  0xeb   : > { %v291_v42 = vmax.f32 %v281_v40, 1e-30  ;;  %v290_v43 = vmax.f32 %v279_v41, 1e-30 }
  0xed   : > { %765 = vrsqrt.f32 %v291_v42 }
  0xee   : > { %767 = vrsqrt.f32 %v290_v43  ;;  %v285_v44 = vpop.xlane.xlu1 %284  ;;  %v283_v45 = vpop.xlane.xlu0 %282 }
  0xef   : > { %v758_v46 = vpop.eup %757  ;;  %v293_v47 = vmax.f32 %v285_v44, 1e-30  ;;  %v292_v48 = vmax.f32 %v283_v45, 1e-30 }
  0xf0   : > { %v760_v49 = vpop.eup %759  ;;  %v1216_v50 = vmul.f32 %v758_v46, %v1143_v0 }
  0xf1   : > { %769 = vrsqrt.f32 %v293_v47  ;;  %v342_v51 = vmul.f32 %v760_v49, %v1145_v1 }
  0xf2   : > { %771 = vrsqrt.f32 %v292_v48  ;;  %v313_v52 = vpop.xlane.xlu1 %312  ;;  %v311_v53 = vpop.xlane.xlu0 %310  ;;  %512 = vst [vmem:[%s1220_s23 + $0x10] sm:$0xff] %v1216_v50 }
  0xf3   : > { %v762_v54 = vpop.eup %761  ;;  %v327_v55 = vmax.f32 %v313_v52, 1e-30  ;;  %v326_v56 = vmax.f32 %v311_v53, 1e-30  ;;  %510 = vst [vmem:[%s1220_s23] sm:$0xff] %v342_v51 }
  0xf4   : > { %v764_v57 = vpop.eup %763  ;;  %v345_v58 = vmul.f32 %v762_v54, %v1147_v2 }
  0xf5   : > { %773 = vrsqrt.f32 %v327_v55  ;;  %v343_v59 = vmul.f32 %v764_v57, %v1153_v5 }
  0xf6   : > { %775 = vrsqrt.f32 %v326_v56  ;;  %v317_v60 = vpop.xlane.xlu1 %316  ;;  %v315_v61 = vpop.xlane.xlu0 %314  ;;  %513 = vst [vmem:[%s1220_s23 + $0x18] sm:$0xff] %v345_v58 }
  0xf7   : > { %v766_v62 = vpop.eup %765  ;;  %v329_v63 = vmax.f32 %v317_v60, 1e-30  ;;  %v328_v0 = vmax.f32 %v315_v61, 1e-30  ;;  %511 = vst [vmem:[%s1220_s23 + $0x8] sm:$0xff] %v343_v59 }
  0xf8   : > { %v768_v1 = vpop.eup %767  ;;  %v347_v3 = vmul.f32 %v766_v62, %v1159_v8 }
  0xf9   : > { %777 = vrsqrt.f32 %v329_v63  ;;  %v346_v4 = vmul.f32 %v768_v1, %v1161_v9 }
  0xfa   : > { %779 = vrsqrt.f32 %v328_v0  ;;  %v321_v2 = vpop.xlane.xlu1 %320  ;;  %v319_v5 = vpop.xlane.xlu0 %318  ;;  %515 = vst [vmem:[%s1220_s23 + $0x28] sm:$0xff] %v347_v3 }
  0xfb   : > { %v770_v6 = vpop.eup %769  ;;  %v331_v7 = vmax.f32 %v321_v2, 1e-30  ;;  %v330_v10 = vmax.f32 %v319_v5, 1e-30  ;;  %514 = vst [vmem:[%s1220_s23 + $0x20] sm:$0xff] %v346_v4 }
  0xfc   : > { %v772_v11 = vpop.eup %771  ;;  %v349_v14 = vmul.f32 %v770_v6, %v1167_v12 }
  0xfd   : > { %781 = vrsqrt.f32 %v331_v7  ;;  %v348_v15 = vmul.f32 %v772_v11, %v1169_v13 }
  0xfe   : > { %783 = vrsqrt.f32 %v330_v10  ;;  %v325_v8 = vpop.xlane.xlu1 %324  ;;  %v323_v18 = vpop.xlane.xlu0 %322  ;;  %517 = vst [vmem:[%s1220_s23 + $0x38] sm:$0xff] %v349_v14 }
  0xff   : > { %v774_v9 = vpop.eup %773  ;;  %v333_v19 = vmax.f32 %v325_v8, 1e-30  ;;  %v332_v22 = vmax.f32 %v323_v18, 1e-30  ;;  %516 = vst [vmem:[%s1220_s23 + $0x30] sm:$0xff] %v348_v15 }
 0x100   : > { %v776_v23 = vpop.eup %775  ;;  %v351_v26 = vmul.f32 %v774_v9, %v1176_v16 }
 0x101   : > { %785 = vrsqrt.f32 %v333_v19  ;;  %v350_v27 = vmul.f32 %v776_v23, %v1179_v17 }
 0x102   : > { %787 = vrsqrt.f32 %v332_v22  ;;  %v359_v30 = vmul.f32 %v351_v26, %v343_v59 }
 0x103   : > { %v778_v12 = vpop.eup %777  ;;  %v358_v31 = vmul.f32 %v350_v27, %v342_v51 }
 0x104   : > { %v780_v32 = vpop.eup %779  ;;  %368 = vadd.xlane.f32.xlu1 %v359_v30  ;;  %v353_v13 = vmul.f32 %v778_v12, %v1186_v20 }
 0x105   : > { %366 = vadd.xlane.f32.xlu0 %v358_v31  ;;  %v352_v33 = vmul.f32 %v780_v32, %v1189_v21 }
 0x106   : > { %v361_v34 = vmul.f32 %v353_v13, %v345_v58 }
 0x107   : > { %v782_v35 = vpop.eup %781  ;;  %v360_v36 = vmul.f32 %v352_v33, %v1216_v50 }
 0x108   : > { %v784_v37 = vpop.eup %783  ;;  %372 = vadd.xlane.f32.xlu1 %v361_v34  ;;  %v355_v16 = vmul.f32 %v782_v35, %v1196_v24 }
 0x109   : > { %370 = vadd.xlane.f32.xlu0 %v360_v36  ;;  %v354_v17 = vmul.f32 %v784_v37, %v1199_v25 }
 0x10a   : > { %v363_v38 = vmul.f32 %v355_v16, %v347_v3 }
 0x10b   : > { %v786_v39 = vpop.eup %785  ;;  %v362_v20 = vmul.f32 %v354_v17, %v346_v4 }
 0x10c   : > { %v788_v40 = vpop.eup %787  ;;  %376 = vadd.xlane.f32.xlu1 %v363_v38  ;;  %v357_v21 = vmul.f32 %v786_v39, %v1206_v28 }
 0x10d   : > { %374 = vadd.xlane.f32.xlu0 %v362_v20  ;;  %v356_v41 = vmul.f32 %v788_v40, %v1209_v29 }
 0x10e   : > { %v365_v42 = vmul.f32 %v357_v21, %v349_v14 }
 0x10f   : > { %v364_v43 = vmul.f32 %v356_v41, %v348_v15 }
 0x110   : > { %380 = vadd.xlane.f32.xlu1 %v365_v42 }
 0x111   : > { %378 = vadd.xlane.f32.xlu0 %v364_v43 }
 0x112   : > { %878 = shalt.err (!%p875_p11)
}
 0x113   : > { %s879_s8 = scalar_lea.hbm %s1251_s4, 1024  ;;  %s883_s27 = scalar_lea.hbm %s1441_s2, 2048 }
 0x114   : > { %p880_p3 = scmp.ne.s32.totalorder %s1251_s4, %s879_s8  ;;  %p884_p2 = scmp.lt.u32.totalorder %s1251_s4, %s1441_s2 }
 0x115   : > { %p885_p4 = scmp.lt.u32.totalorder %s883_s27, %s879_s8  ;;  %p887_p13 = scmp.lt.u32.totalorder %s879_s8, %s1251_s4 }
 0x116   : > { %p881_p8 = pnand %p880_p3, %p1452_p1 }
 0x117   : > { %p886_p6 = por %p885_p4, %p884_p2 }
 0x118   : > { %p882_p0 = pneg %p881_p8 }
 0x119   : > { %p888_p12 = por %p887_p13, %p886_p6 }
 0x11b   : > { %p889_p10 = pnand %p888_p12, %p882_p0 }
 0x11d   : > { %892 = shalt.err (!%p889_p10)
}
 0x11e   : > { %s942_s23 = smov 128   ;;  %s943_s11 = smov 8   ;;  %vm518_vm0 = vcmask 7168  }
 0x11f   : > { %706 = dma.vmem_to_hbm [thread:$0]  (%p1452_p1), %s1253_s10, 1024, %s1251_s4, %s528_s5, %s942_s23, %s942_s23, %s943_s11  }
 0x120   : > { %s684_s24 = sshll.u32 %s985_s16, 3 }
 0x121   : > { %p241_p1 = scmp.lt.s32.totalorder %s684_s24, 15 }
 0x123   : > { %s1460_s24 = smov (!%p241_p1, %s684_s24), 15 }
 0x124   : > { %s685_s16 = sshll.u32 %s1460_s24, 3 }
 0x125   : > { %s1348_s20 = scalar_lea.vmem %s1442_s3, %s685_s16 }
 0x191   : > { %v1279_v24 = vpop.xlane.xlu1 %368 }
 0x192   : > { %v383_v25 = vmul.f32 %v1279_v24, %v1279_v24  ;;  %v1283_v28 = vpop.xlane.xlu0 %366  ;;  %v471_v3 = vmul.f32 0.87758255, %v1279_v24  ;;  %v687_v4 = vadd.f32 -0.23971277, %v1279_v24  ;;  %vm463_vm1 = vcmp.gt.f32.partialorder %v1279_v24, -0.87758255 }
 0x193   : > { %v382_v29 = vmul.f32 %v1283_v28, %v1283_v28  ;;  %v470_v6 = vmul.f32 0.87758255, %v1283_v28  ;;  %v686_v7 = vadd.f32 -0.23971277, %v1283_v28  ;;  %vm462_vm2 = vcmp.gt.f32.partialorder %v1283_v28, -0.87758255 }
 0x194   : > { %v391_v44 = vsub.f32 1.0, %v383_v25 }
 0x195   : > { %v390_v45 = vsub.f32 1.0, %v382_v29  ;;  %v1287_v46 = vpop.xlane.xlu1 %372 }
 0x196   : > { %v399_v47 = vmax.f32 %v391_v44, 0.0  ;;  %v385_v48 = vmul.f32 %v1287_v46, %v1287_v46  ;;  %v1291_v49 = vpop.xlane.xlu0 %370  ;;  %v1328_v10 = vmul.f32 0.87758255, %v1287_v46  ;;  %v689_v32 = vadd.f32 -0.23971277, %v1287_v46 }
 0x197   : > { %v398_v50 = vmax.f32 %v390_v45, 0.0  ;;  %v384_v51 = vmul.f32 %v1291_v49, %v1291_v49  ;;  %vm465_vm7 = vcmp.gt.f32.partialorder %v1287_v46, -0.87758255  ;;  %v472_v35 = vmul.f32 0.87758255, %v1291_v49 }
 0x198   : > { %789 = vrsqrt.f32 %v399_v47  ;;  %v393_v53 = vsub.f32 1.0, %v385_v48  ;;  %vm415_vm3 = vcmp.eq.f32.partialorder %v399_v47, inf  ;;  %vm417_vm4 = vcmp.eq.f32.partialorder %v399_v47, 0.0 }
 0x199   : > { %791 = vrsqrt.f32 %v398_v50  ;;  %v1295_v52 = vpop.xlane.xlu1 %376  ;;  %v392_v54 = vsub.f32 1.0, %v384_v51  ;;  %v418_v9 = vand.u32 2147483648, %v399_v47  ;;  %vm408_vm5 = vcmp.eq.f32.partialorder %v398_v50, inf }
 0x19a   : > { %v1298_v55 = vpop.xlane.xlu0 %374  ;;  %v387_v56 = vmul.f32 %v1295_v52, %v1295_v52  ;;  %v1302_v57 = vmax.f32 %v393_v53, 0.0  ;;  %v411_v23 = vand.u32 2147483648, %v398_v50  ;;  %vm410_vm6 = vcmp.eq.f32.partialorder %v398_v50, 0.0 }
 0x19b   : > { %v1304_v58 = vmax.f32 %v392_v54, 0.0  ;;  %v386_v59 = vmul.f32 %v1298_v55, %v1298_v55  ;;  %v688_v36 = vadd.f32 -0.23971277, %v1291_v49  ;;  %vm464_vm9 = vcmp.gt.f32.partialorder %v1291_v49, -0.87758255 }
 0x19c   : > { %v395_v60 = vsub.f32 1.0, %v387_v56  ;;  %793 = vrsqrt.f32 %v1302_v57  ;;  %vm429_vm8 = vcmp.eq.f32.partialorder %v1302_v57, inf  ;;  %vm431_vm10 = vcmp.eq.f32.partialorder %v1302_v57, 0.0 }
 0x19d   : > { %v1308_v61 = vpop.xlane.xlu1 %380  ;;  %795 = vrsqrt.f32 %v1304_v58  ;;  %v394_v0 = vsub.f32 1.0, %v386_v59  ;;  %v432_v39 = vand.u32 2147483648, %v1302_v57  ;;  %vm422_vm11 = vcmp.eq.f32.partialorder %v1304_v58, inf }
 0x19e   : > { %v1311_v62 = vpop.xlane.xlu0 %378  ;;  %v1314_v63 = vmax.f32 %v395_v60, 0.0  ;;  %v389_v1 = vmul.f32 %v1308_v61, %v1308_v61  ;;  %v425_v41 = vand.u32 2147483648, %v1304_v58  ;;  %vm424_vm12 = vcmp.eq.f32.partialorder %v1304_v58, 0.0 }
 0x19f   : > { %v388_v2 = vmul.f32 %v1311_v62, %v1311_v62  ;;  %v1332_v15 = vmax.f32 %v394_v0, 0.0  ;;  %vm467_vm13 = vcmp.gt.f32.partialorder %v1295_v52, -0.87758255  ;;  %v475_v28 = vmul.f32 0.87758255, %v1295_v52 }
 0x1a0   : > { %797 = vrsqrt.f32 %v1314_v63  ;;  %v397_v8 = vsub.f32 1.0, %v389_v1  ;;  %vm443_vm14 = vcmp.eq.f32.partialorder %v1314_v63, inf  ;;  %v446_v48 = vand.u32 2147483648, %v1314_v63 }
 0x1a1   : > { %v396_v18 = vsub.f32 1.0, %v388_v2  ;;  %799 = vrsqrt.f32 %v1332_v15  ;;  %vm445_vm15 = vcmp.eq.f32.partialorder %v1314_v63, 0.0  ;;  %v691_v54 = vadd.f32 -0.23971277, %v1295_v52 }
 0x1a2   : > { %v790_v5 = vpop.eup %789  ;;  %v1336_v30 = vmax.f32 %v397_v8, 0.0  ;;  %v474_v59 = vmul.f32 0.87758255, %v1298_v55  ;;  %v439_v1 = vand.u32 2147483648, %v1332_v15  ;;  %v690_v2 = vadd.f32 -0.23971277, %v1298_v55 }
 0x1a3   : > { %v792_v11 = vpop.eup %791  ;;  %v414_v14 = vmul.f32 %v790_v5, %v399_v47  ;;  %v1339_v13 = vmax.f32 %v396_v18, 0.0  ;;  %v477_v52 = vmul.f32 0.87758255, %v1308_v61 }
 0x1a4   : > { %v407_v19 = vmul.f32 %v792_v11, %v398_v50  ;;  %801 = vrsqrt.f32 %v1336_v30  ;;  %v460_v49 = vand.u32 2147483648, %v1336_v30 }
 0x1a5   : > { %v416_v22 = vsel %vm415_vm3, %v399_v47, %v414_v14  ;;  %803 = vrsqrt.f32 %v1339_v13  ;;  %vm457_vm3 = vcmp.eq.f32.partialorder %v1336_v30, inf  ;;  %v453_v8 = vand.u32 2147483648, %v1339_v13 }
 0x1a6   : > { %v419_v26 = vsel %vm417_vm4, %v418_v9, %v416_v22  ;;  %v409_v27 = vsel %vm408_vm5, %v398_v50, %v407_v19  ;;  %v794_v33 = vpop.eup %793  ;;  %vm459_vm4 = vcmp.eq.f32.partialorder %v1336_v30, 0.0  ;;  %vm450_vm5 = vcmp.eq.f32.partialorder %v1339_v13, inf }
 0x1a7   : > { %v479_v12 = vmul.f32 0.47942555, %v419_v26  ;;  %v412_v31 = vsel %vm410_vm6, %v411_v23, %v409_v27  ;;  %v796_v37 = vpop.eup %795  ;;  %v428_v17 = vmul.f32 %v794_v33, %v1302_v57  ;;  %vm452_vm6 = vcmp.eq.f32.partialorder %v1339_v13, 0.0 }
 0x1a8   : > { %v478_v34 = vmul.f32 0.47942555, %v412_v31  ;;  %v421_v20 = vmul.f32 %v796_v37, %v1304_v58  ;;  %v476_v27 = vmul.f32 0.87758255, %v1311_v62  ;;  %v693_v31 = vadd.f32 -0.23971277, %v1308_v61 }
 0x1a9   : > { %v487_v16 = vsub.f32 %v471_v3, %v479_v12  ;;  %v430_v21 = vsel %vm429_vm8, %v1302_v57, %v428_v17  ;;  %vm469_vm8 = vcmp.gt.f32.partialorder %v1308_v61, -0.87758255 }
 0x1aa   : > { %v486_v38 = vsub.f32 %v470_v6, %v478_v34  ;;  %v798_v42 = vpop.eup %797  ;;  %v433_v25 = vsel %vm431_vm10, %v432_v39, %v430_v21  ;;  %v423_v29 = vsel %vm422_vm11, %v1304_v58, %v421_v20 }
 0x1ab   : > { %v503_v40 = vsel %vm463_vm1, %v487_v16, %v687_v4  ;;  %v481_v24 = vmul.f32 0.47942555, %v433_v25  ;;  %v426_v44 = vsel %vm424_vm12, %v425_v41, %v423_v29  ;;  %v442_v45 = vmul.f32 %v798_v42, %v1314_v63  ;;  %v800_v50 = vpop.eup %799 }
 0x1ac   : > { %520 = vst.msk [vmem:[%s1348_s20 + $0x8] sm:$0xff] %vm518_vm0, %v503_v40  ;;  %v502_v43 = vsel %vm462_vm2, %v486_v38, %v686_v7  ;;  %v480_v47 = vmul.f32 0.47942555, %v426_v44  ;;  %v435_v58 = vmul.f32 %v800_v50, %v1332_v15  ;;  %vm436_vm1 = vcmp.eq.f32.partialorder %v1332_v15, inf }
 0x1ad   : > { %519 = vst.msk [vmem:[%s1348_s20] sm:$0xff] %vm518_vm0, %v502_v43  ;;  %v489_v51 = vsub.f32 %v1328_v10, %v481_v24  ;;  %v444_v53 = vsel %vm443_vm14, %v1314_v63, %v442_v45  ;;  %vm438_vm2 = vcmp.eq.f32.partialorder %v1332_v15, 0.0 }
 0x1ae   : > { %v488_v56 = vsub.f32 %v472_v35, %v480_v47  ;;  %v447_v57 = vsel %vm445_vm15, %v446_v48, %v444_v53  ;;  %v802_v3 = vpop.eup %801  ;;  %v437_v4 = vsel %vm436_vm1, %v1332_v15, %v435_v58 }
 0x1af   : > { %v505_v60 = vsel %vm465_vm7, %v489_v51, %v689_v32  ;;  %v483_v0 = vmul.f32 0.47942555, %v447_v57  ;;  %v804_v46 = vpop.eup %803  ;;  %v440_v6 = vsel %vm438_vm2, %v439_v1, %v437_v4  ;;  %v456_v7 = vmul.f32 %v802_v3, %v1336_v30 }
 0x1b0   : > { %522 = vst.msk [vmem:[%s1348_s20 + $0x18] sm:$0xff] %vm518_vm0, %v505_v60  ;;  %v504_v63 = vsel %vm464_vm9, %v488_v56, %v688_v36  ;;  %v482_v10 = vmul.f32 0.47942555, %v440_v6  ;;  %v449_v11 = vmul.f32 %v804_v46, %v1339_v13  ;;  %vm466_vm7 = vcmp.gt.f32.partialorder %v1298_v55, -0.87758255 }
 0x1b1   : > { %521 = vst.msk [vmem:[%s1348_s20 + $0x10] sm:$0xff] %vm518_vm0, %v504_v63  ;;  %v491_v5 = vsub.f32 %v475_v28, %v483_v0  ;;  %v458_v15 = vsel %vm457_vm3, %v1336_v30, %v456_v7  ;;  %vm468_vm9 = vcmp.gt.f32.partialorder %v1311_v62, -0.87758255 }
 0x1b2   : > { %v490_v18 = vsub.f32 %v474_v59, %v482_v10  ;;  %v461_v9 = vsel %vm459_vm4, %v460_v49, %v458_v15  ;;  %v451_v19 = vsel %vm450_vm5, %v1339_v13, %v449_v11  ;;  %v692_v13 = vadd.f32 -0.23971277, %v1311_v62 }
 0x1b3   : > { %v507_v14 = vsel %vm467_vm13, %v491_v5, %v691_v54  ;;  %v485_v22 = vmul.f32 0.47942555, %v461_v9  ;;  %v454_v23 = vsel %vm452_vm6, %v453_v8, %v451_v19 }
 0x1b4   : > { %524 = vst.msk [vmem:[%s1348_s20 + $0x28] sm:$0xff] %vm518_vm0, %v507_v14  ;;  %v506_v26 = vsel %vm466_vm7, %v490_v18, %v690_v2  ;;  %v484_v30 = vmul.f32 0.47942555, %v454_v23 }
 0x1b5   : > { %523 = vst.msk [vmem:[%s1348_s20 + $0x20] sm:$0xff] %vm518_vm0, %v506_v26  ;;  %v493_v12 = vsub.f32 %v477_v52, %v485_v22 }
 0x1b6   : > { %v492_v32 = vsub.f32 %v476_v27, %v484_v30 }
 0x1b7   : > { %v509_v55 = vsel %vm469_vm8, %v493_v12, %v693_v31 }
 0x1b8   : > { %526 = vst.msk [vmem:[%s1348_s20 + $0x38] sm:$0xff] %vm518_vm0, %v509_v55  ;;  %v508_v33 = vsel %vm468_vm9, %v492_v32, %v692_v13 }
 0x1b9   : > { %525 = vst.msk [vmem:[%s1348_s20 + $0x30] sm:$0xff] %vm518_vm0, %v508_v33 }
 0x1ba PF: > { %s565_s29 = sand.u32 1, %s923_s12   ;;  %p1453_p5 = scmp.ne.s32.totalorder %s1448_s25, 0 }
 0x1bb   : > { %p1454_p7 = scmp.ge.s32.totalorder %s935_s15, 2  ;;  %s566_s4 = scalar_lea.sflag [#allocation4], %s565_s29 }
 0x1bd   : > { %p716_p9 = pnand %p1454_p7, %p1453_p5 }
 0x1bf   : > { %918 = dma.done.wait (!%p716_p9), %s566_s4, 1024  }
 0x1c0   : > { %920 = vsyncadd (!%p716_p9), %s566_s4, 4294966272  ;;  %p20_p11 = scmp.ge.s32.totalorder %s989_s18, 4   ;;  %s1455_s12 = smov %s927_s13 }
 0x1c1   : > { %s1456_s13 = smov %s931_s14  ;;  %s1457_s14 = smov %s1001_s21 }
 0x1c2   : > { %s1458_s15 = smov %s989_s18  ;;  %22 = sbr.rel (!%p20_p11) target bundleno = 7 (0x7), region = 98 }
 0x1c9   :  { %579 = vsyncpa [#allocation3], 1 }
 0x1ca   :  { %581 = vsyncpa [#allocation3 + $0x1], 1 }
 0x1cb   :  { %582 = vsyncpa [#allocation6], 1 }
 0x1cc   :  { %584 = vsyncpa [#allocation6 + $0x1], 1 }
 0x1cd   :  { %585 = vsyncpa [#allocation4], 1 }
 0x1ce   :  { %587 = vsyncpa [#allocation4 + $0x1], 1 }

</bundles_post_ra>
